<compile_context>
chip_gen: v6e
topology: v6e:2x2x1
jax: 0.10.0
libtpu: 0.0.40
codegen_flags: <defaults>
</compile_context>

<pallas_src>
import jax
import jax.numpy as jnp
from jax.experimental import pallas as pl
from jax.experimental.pallas import tpu as pltpu


def resnet_relu4_kernel(x_ref,
                        semb_ref, w1_ref, b1_ref,
                        w2_ref, b2_ref,
                        w3_ref, b3_ref,
                        w4_ref, b4_ref,
                        wout_ref, o_ref):
    cdt = x_ref.dtype                       # compute dtype (f32 or bf16)
    x = x_ref[...]                          # (tile_rows, pack*dim), natively narrow

    # s = x @ Ix, lane-packed: semb = kron(I_pack, Ix) is (pack*dim, pack*m).
    # Tiny-K MXU op, f32 result.
    s = jnp.dot(x, semb_ref[...], preferred_element_type=jnp.float32)

    # fc1 folded through the packing: w1p = kron(I_pack, w1)  (pack*dim, pack*m)
    y = jnp.dot(x, w1_ref[...], preferred_element_type=jnp.float32) + b1_ref[...]
    y = jnp.maximum(y, 0.0)                 # relu(y**1) since degree == 1
    y = jnp.dot(y.astype(cdt), w2_ref[...], preferred_element_type=jnp.float32) + b2_ref[...]
    y = jnp.maximum(y, 0.0)
    y = y + s
    s = y
    y = jnp.dot(y.astype(cdt), w3_ref[...], preferred_element_type=jnp.float32) + b3_ref[...]
    y = jnp.maximum(y, 0.0)
    y = jnp.dot(y.astype(cdt), w4_ref[...], preferred_element_type=jnp.float32) + b4_ref[...]
    y = jnp.maximum(y, 0.0)
    y = y + s

    # outlayer (no bias): block-diagonal (pack*m, pack) matmul keeps the `pack`
    # packed rows separate (a full-lane sum would mix them).  f32 throughout.
    o_ref[...] = jnp.dot(y, wout_ref[...], preferred_element_type=jnp.float32)


def _default_compute_dtype():
    # bf16 default on v6e/v7x (full-rate MXU, halved HBM stream); f32 on
    # v5e/older (no bf16 VPU, tiny MXU benefit at m=32).
    try:
        kind = jax.devices()[0].device_kind.lower()
    except Exception:
        return jnp.float32
    if "v6" in kind or "v7" in kind:
        return jnp.bfloat16
    return jnp.float32


def resnet_relu4_forward(x, params, *, max_tile_rows=1024, compute_dtype=None):
    """x: (N, dim) f32.  Returns (N,) f32 — matches PyTorch forward with
    boundary_control_type='none'."""
    N, dim = x.shape
    m = params["w1"].shape[1]
    assert dim <= m, "identity embedding requires dim <= m"
    if compute_dtype is None:
        compute_dtype = _default_compute_dtype()

    # --- lane packing factor --------------------------------------------------
    pack = 128 // m if (m <= 128 and 128 % m == 0) else 1
    L = pack * m                    # activation lane width (128 for m=32)
    kp = pack * dim                 # packed-input lane width (8 for dim=2)

    # --- tile sizing over packed rows ----------------------------------------
    # Big tiles (amortize ~0.35 us/step) but keep num_tiles >= 2 when possible
    # so the "parallel" axis feeds both v7x TensorCores.
    rows_needed = -(-N // pack)
    rows8 = max(8, ((rows_needed + 7) // 8) * 8)
    half = -(-rows8 // 2)
    tile_rows = max(8, min(max_tile_rows, ((half + 7) // 8) * 8))
    num_tiles = -(-rows8 // tile_rows)
    rows_pad = num_tiles * tile_rows
    n_pad = rows_pad * pack

    # --- one-time prep outside the kernel ------------------------------------
    eye_p = jnp.eye(pack, dtype=jnp.float32)
    # identity embedding, lane-packed: (kp, L)
    semb = jnp.kron(eye_p, jnp.eye(dim, m, dtype=jnp.float32)).astype(compute_dtype)
    # fc1 folded through the packing: (kp, L)
    w1p = jnp.kron(eye_p, params["w1"].astype(jnp.float32)).astype(compute_dtype)
    # fc2..fc4 block-diagonal: (L, L)
    w2 = jnp.kron(eye_p, params["w2"].astype(jnp.float32)).astype(compute_dtype)
    w3 = jnp.kron(eye_p, params["w3"].astype(jnp.float32)).astype(compute_dtype)
    w4 = jnp.kron(eye_p, params["w4"].astype(jnp.float32)).astype(compute_dtype)
    # biases tiled across the packed groups: (1, L), kept f32
    b1 = jnp.tile(params["b1"].reshape(1, m).astype(jnp.float32), (1, pack))
    b2 = jnp.tile(params["b2"].reshape(1, m).astype(jnp.float32), (1, pack))
    b3 = jnp.tile(params["b3"].reshape(1, m).astype(jnp.float32), (1, pack))
    b4 = jnp.tile(params["b4"].reshape(1, m).astype(jnp.float32), (1, pack))
    # block-diagonal outlayer: (L, pack), f32
    wout = jnp.kron(eye_p, params["w_out"].reshape(m, 1).astype(jnp.float32))

    # x packed: zero-pad the batch to n_pad rows, then a pure contiguous reshape
    # (n_pad, dim) -> (rows_pad, pack*dim).  x HBM traffic stays at its native
    # width — no 16x-inflated (N, m) materialization.
    x_packed = jnp.zeros((n_pad, dim), compute_dtype).at[:N].set(
        x.astype(compute_dtype)).reshape(rows_pad, kp)

    row_spec = pl.BlockSpec((tile_rows, kp), lambda i: (i, 0))

    def const(shape):
        # small resident operands: same block every grid step (stays in VMEM)
        return pl.BlockSpec(shape, lambda i: (0, 0))

    out = pl.pallas_call(
        resnet_relu4_kernel,
        out_shape=jax.ShapeDtypeStruct((rows_pad, pack), jnp.float32),
        grid=(num_tiles,),
        in_specs=[row_spec,
                  const((kp, L)), const((kp, L)), const((1, L)),
                  const((L, L)), const((1, L)),
                  const((L, L)), const((1, L)),
                  const((L, L)), const((1, L)),
                  const((L, pack))],
        out_specs=pl.BlockSpec((tile_rows, pack), lambda i: (i, 0)),
        compiler_params=pltpu.CompilerParams(
            dimension_semantics=("parallel",),
            vmem_limit_bytes=32 * 1024 * 1024),
    )(x_packed, semb, w1p, b1, w2, b2, w3, b3, w4, b4, wout)

    # (rows_pad, pack) -> (n_pad,) -> drop batch padding; matches squeeze(1)
    return out.reshape(n_pad)[:N]


def init_params(key, dim, m):
    """Deterministic synthetic parameters.  PyTorch Linear weight (out, in) is
    stored here transposed as (in, out) so the kernel computes x @ W + b."""
    ks = jax.random.split(key, 9)

    def lin(kw, kb, fan_in, fan_out):
        bound = 1.0 / jnp.sqrt(fan_in)
        w = jax.random.uniform(kw, (fan_in, fan_out), jnp.float32, -bound, bound)
        b = jax.random.uniform(kb, (1, fan_out), jnp.float32, -bound, bound)
        return w, b

    w1, b1 = lin(ks[0], ks[1], dim, m)
    w2, b2 = lin(ks[2], ks[3], m, m)
    w3, b3 = lin(ks[4], ks[5], m, m)
    w4, b4 = lin(ks[6], ks[7], m, m)
    bound = 1.0 / jnp.sqrt(m)
    w_out = jax.random.uniform(ks[8], (m, 1), jnp.float32, -bound, bound)

    return dict(w1=w1, b1=b1, w2=w2, b2=b2, w3=w3, b3=b3, w4=w4, b4=b4,
                w_out=w_out)


def reference_forward(x, p):
    """Pure-JAX reference of the original module forward (uses explicit Ix)."""
    dim = x.shape[1]
    m = p["w1"].shape[1]
    Ix = jnp.zeros((dim, m), jnp.float32).at[
        jnp.arange(dim), jnp.arange(dim)].set(1.0)
    s = x @ Ix
    y = jnp.maximum(x @ p["w1"] + p["b1"], 0.0)
    y = jnp.maximum(y @ p["w2"] + p["b2"], 0.0)
    y = y + s
    s = y
    y = jnp.maximum(y @ p["w3"] + p["b3"], 0.0)
    y = jnp.maximum(y @ p["w4"] + p["b4"], 0.0)
    y = y + s
    return (y @ p["w_out"])[:, 0]


if __name__ == "__main__":
    key = jax.random.PRNGKey(0)
    k_x, k_p, k_x2 = jax.random.split(key, 3)

    dim, m = 2, 32                       # module defaults: dim=2, hidden m
    params = init_params(k_p, dim, m)

    # small case: batch 8 (single tile, single packed-row group of 8)
    x = jax.random.normal(k_x, (8, dim), jnp.float32)
    out = jax.block_until_ready(
        resnet_relu4_forward(x, params, compute_dtype=jnp.float32))
    ref = reference_forward(x, params)
    assert out.shape == (8,)
    assert jnp.allclose(out, ref, atol=1e-4, rtol=1e-4), (out, ref)

    # larger, non-multiple-of-tile batch: exercises packing, 2-step parallel grid
    x2 = jax.random.normal(k_x2, (1000, dim), jnp.float32)
    out2 = jax.block_until_ready(
        resnet_relu4_forward(x2, params, compute_dtype=jnp.float32))
    ref2 = reference_forward(x2, params)
    assert out2.shape == (1000,)
    assert jnp.allclose(out2, ref2, atol=1e-4, rtol=1e-4)

    # auto dtype (bf16 on v6e/v7x, f32 on v5e/older)
    out_auto = jax.block_until_ready(resnet_relu4_forward(x2, params))
    assert out_auto.shape == (1000,)
    assert bool(jnp.all(jnp.isfinite(out_auto)))
    assert float(jnp.max(jnp.abs(out_auto - ref2))) < 0.25

    # explicit bf16 compute path (f32 accumulation / bias / relu / residual)
    out_bf16 = jax.block_until_ready(
        resnet_relu4_forward(x2, params, compute_dtype=jnp.bfloat16))
    assert out_bf16.shape == (1000,)
    assert bool(jnp.all(jnp.isfinite(out_bf16)))
    assert float(jnp.max(jnp.abs(out_bf16 - ref2))) < 0.25

    print("KERNEL_OK")
</pallas_src>

<mosaic_0001>
module attributes {stable_mosaic.version = 11 : i64} {
  func.func @resnet_relu4_kernel(%arg0: i32, %arg1: memref<8x8xf32, #tpu.memory_space<vmem>>, %arg2: memref<8x128xf32, #tpu.memory_space<vmem>>, %arg3: memref<8x128xf32, #tpu.memory_space<vmem>>, %arg4: memref<1x128xf32, #tpu.memory_space<vmem>>, %arg5: memref<128x128xf32, #tpu.memory_space<vmem>>, %arg6: memref<1x128xf32, #tpu.memory_space<vmem>>, %arg7: memref<128x128xf32, #tpu.memory_space<vmem>>, %arg8: memref<1x128xf32, #tpu.memory_space<vmem>>, %arg9: memref<128x128xf32, #tpu.memory_space<vmem>>, %arg10: memref<1x128xf32, #tpu.memory_space<vmem>>, %arg11: memref<128x4xf32, #tpu.memory_space<vmem>>, %arg12: memref<8x4xf32, #tpu.memory_space<vmem>>) attributes {dimension_semantics = [#tpu.dimension_semantics<parallel>], iteration_bounds = array<i64: 1>, scalar_prefetch = 0 : i64, scratch_operands = 0 : i64, tpu.core_type = #tpu.core_type<tc>, window_params = [{transform_indices = @transform_0, window_bounds = array<i64: 8, 8>}, {pipeline_mode = #tpu.pipeline_mode<synchronous>, transform_indices = @transform_1, window_bounds = array<i64: 8, 128>}, {pipeline_mode = #tpu.pipeline_mode<synchronous>, transform_indices = @transform_2, window_bounds = array<i64: 8, 128>}, {pipeline_mode = #tpu.pipeline_mode<synchronous>, transform_indices = @transform_3, window_bounds = array<i64: 1, 128>}, {pipeline_mode = #tpu.pipeline_mode<synchronous>, transform_indices = @transform_4, window_bounds = array<i64: 128, 128>}, {pipeline_mode = #tpu.pipeline_mode<synchronous>, transform_indices = @transform_5, window_bounds = array<i64: 1, 128>}, {pipeline_mode = #tpu.pipeline_mode<synchronous>, transform_indices = @transform_6, window_bounds = array<i64: 128, 128>}, {pipeline_mode = #tpu.pipeline_mode<synchronous>, transform_indices = @transform_7, window_bounds = array<i64: 1, 128>}, {pipeline_mode = #tpu.pipeline_mode<synchronous>, transform_indices = @transform_8, window_bounds = array<i64: 128, 128>}, {pipeline_mode = #tpu.pipeline_mode<synchronous>, transform_indices = @transform_9, window_bounds = array<i64: 1, 128>}, {pipeline_mode = #tpu.pipeline_mode<synchronous>, transform_indices = @transform_10, window_bounds = array<i64: 128, 4>}, {transform_indices = @transform_11, window_bounds = array<i64: 8, 4>}]} {
    %c0 = arith.constant 0 : index
    %c0_0 = arith.constant 0 : index
    %0 = vector.load %arg1[%c0, %c0_0] : memref<8x8xf32, #tpu.memory_space<vmem>>, vector<8x8xf32>
    %c0_1 = arith.constant 0 : index
    %c0_2 = arith.constant 0 : index
    %1 = vector.load %arg2[%c0_1, %c0_2] : memref<8x128xf32, #tpu.memory_space<vmem>>, vector<8x128xf32>
    %cst = arith.constant dense<0.000000e+00> : vector<8x128xf32>
    %2 = tpu.matmul %0, %1, %cst {dimension_numbers = #tpu.dot_dimension_numbers<[1], [0], [0], [1], [0, 0, 1, 1], [], []>} : vector<8x8xf32>, vector<8x128xf32>, vector<8x128xf32> -> vector<8x128xf32>
    %c0_3 = arith.constant 0 : index
    %c0_4 = arith.constant 0 : index
    %3 = vector.load %arg3[%c0_3, %c0_4] : memref<8x128xf32, #tpu.memory_space<vmem>>, vector<8x128xf32>
    %cst_5 = arith.constant dense<0.000000e+00> : vector<8x128xf32>
    %4 = tpu.matmul %0, %3, %cst_5 {dimension_numbers = #tpu.dot_dimension_numbers<[1], [0], [0], [1], [0, 0, 1, 1], [], []>} : vector<8x8xf32>, vector<8x128xf32>, vector<8x128xf32> -> vector<8x128xf32>
    %c0_6 = arith.constant 0 : index
    %c0_7 = arith.constant 0 : index
    %5 = vector.load %arg4[%c0_6, %c0_7] : memref<1x128xf32, #tpu.memory_space<vmem>>, vector<1x128xf32>
    %6 = vector.broadcast %5 : vector<1x128xf32> to vector<8x128xf32>
    %7 = arith.addf %4, %6 : vector<8x128xf32>
    %cst_8 = arith.constant 0.000000e+00 : f32
    %8 = vector.broadcast %cst_8 : f32 to vector<8x128xf32>
    %9 = arith.maximumf %7, %8 : vector<8x128xf32>
    %c0_9 = arith.constant 0 : index
    %c0_10 = arith.constant 0 : index
    %10 = vector.load %arg5[%c0_9, %c0_10] : memref<128x128xf32, #tpu.memory_space<vmem>>, vector<128x128xf32>
    %cst_11 = arith.constant dense<0.000000e+00> : vector<8x128xf32>
    %11 = tpu.matmul %9, %10, %cst_11 {dimension_numbers = #tpu.dot_dimension_numbers<[1], [0], [0], [1], [0, 0, 1, 1], [], []>} : vector<8x128xf32>, vector<128x128xf32>, vector<8x128xf32> -> vector<8x128xf32>
    %c0_12 = arith.constant 0 : index
    %c0_13 = arith.constant 0 : index
    %12 = vector.load %arg6[%c0_12, %c0_13] : memref<1x128xf32, #tpu.memory_space<vmem>>, vector<1x128xf32>
    %13 = vector.broadcast %12 : vector<1x128xf32> to vector<8x128xf32>
    %14 = arith.addf %11, %13 : vector<8x128xf32>
    %cst_14 = arith.constant 0.000000e+00 : f32
    %15 = vector.broadcast %cst_14 : f32 to vector<8x128xf32>
    %16 = arith.maximumf %14, %15 : vector<8x128xf32>
    %17 = arith.addf %16, %2 : vector<8x128xf32>
    %c0_15 = arith.constant 0 : index
    %c0_16 = arith.constant 0 : index
    %18 = vector.load %arg7[%c0_15, %c0_16] : memref<128x128xf32, #tpu.memory_space<vmem>>, vector<128x128xf32>
    %cst_17 = arith.constant dense<0.000000e+00> : vector<8x128xf32>
    %19 = tpu.matmul %17, %18, %cst_17 {dimension_numbers = #tpu.dot_dimension_numbers<[1], [0], [0], [1], [0, 0, 1, 1], [], []>} : vector<8x128xf32>, vector<128x128xf32>, vector<8x128xf32> -> vector<8x128xf32>
    %c0_18 = arith.constant 0 : index
    %c0_19 = arith.constant 0 : index
    %20 = vector.load %arg8[%c0_18, %c0_19] : memref<1x128xf32, #tpu.memory_space<vmem>>, vector<1x128xf32>
    %21 = vector.broadcast %20 : vector<1x128xf32> to vector<8x128xf32>
    %22 = arith.addf %19, %21 : vector<8x128xf32>
    %cst_20 = arith.constant 0.000000e+00 : f32
    %23 = vector.broadcast %cst_20 : f32 to vector<8x128xf32>
    %24 = arith.maximumf %22, %23 : vector<8x128xf32>
    %c0_21 = arith.constant 0 : index
    %c0_22 = arith.constant 0 : index
    %25 = vector.load %arg9[%c0_21, %c0_22] : memref<128x128xf32, #tpu.memory_space<vmem>>, vector<128x128xf32>
    %cst_23 = arith.constant dense<0.000000e+00> : vector<8x128xf32>
    %26 = tpu.matmul %24, %25, %cst_23 {dimension_numbers = #tpu.dot_dimension_numbers<[1], [0], [0], [1], [0, 0, 1, 1], [], []>} : vector<8x128xf32>, vector<128x128xf32>, vector<8x128xf32> -> vector<8x128xf32>
    %c0_24 = arith.constant 0 : index
    %c0_25 = arith.constant 0 : index
    %27 = vector.load %arg10[%c0_24, %c0_25] : memref<1x128xf32, #tpu.memory_space<vmem>>, vector<1x128xf32>
    %28 = vector.broadcast %27 : vector<1x128xf32> to vector<8x128xf32>
    %29 = arith.addf %26, %28 : vector<8x128xf32>
    %cst_26 = arith.constant 0.000000e+00 : f32
    %30 = vector.broadcast %cst_26 : f32 to vector<8x128xf32>
    %31 = arith.maximumf %29, %30 : vector<8x128xf32>
    %32 = arith.addf %31, %17 : vector<8x128xf32>
    %c0_27 = arith.constant 0 : index
    %c0_28 = arith.constant 0 : index
    %33 = vector.load %arg11[%c0_27, %c0_28] : memref<128x4xf32, #tpu.memory_space<vmem>>, vector<128x4xf32>
    %cst_29 = arith.constant dense<0.000000e+00> : vector<8x4xf32>
    %34 = tpu.matmul %32, %33, %cst_29 {dimension_numbers = #tpu.dot_dimension_numbers<[1], [0], [0], [1], [0, 0, 1, 1], [], []>} : vector<8x128xf32>, vector<128x4xf32>, vector<8x4xf32> -> vector<8x4xf32>
    %c0_30 = arith.constant 0 : index
    %c0_31 = arith.constant 0 : index
    %35 = vector.load %arg12[%c0_30, %c0_31] : memref<8x4xf32, #tpu.memory_space<vmem>>, vector<8x4xf32>
    tpu.vector_store %arg12[%c0_30, %c0_31], %34 {strides = array<i32>} : memref<8x4xf32, #tpu.memory_space<vmem>>, vector<8x4xf32>,
    return
  }
  func.func @transform_0(%arg0: i32) -> (i32, i32) {
    %c0_i32 = arith.constant 0 : i32
    %c0_i32_0 = arith.constant 0 : i32
    return %arg0, %c0_i32 : i32, i32
  }
  func.func @transform_1(%arg0: i32) -> (i32, i32) {
    %c0_i32 = arith.constant 0 : i32
    %c0_i32_0 = arith.constant 0 : i32
    %c0_i32_1 = arith.constant 0 : i32
    return %c0_i32, %c0_i32_0 : i32, i32
  }
  func.func @transform_2(%arg0: i32) -> (i32, i32) {
    %c0_i32 = arith.constant 0 : i32
    %c0_i32_0 = arith.constant 0 : i32
    %c0_i32_1 = arith.constant 0 : i32
    return %c0_i32, %c0_i32_0 : i32, i32
  }
  func.func @transform_3(%arg0: i32) -> (i32, i32) {
    %c0_i32 = arith.constant 0 : i32
    %c0_i32_0 = arith.constant 0 : i32
    %c0_i32_1 = arith.constant 0 : i32
    return %c0_i32, %c0_i32_0 : i32, i32
  }
  func.func @transform_4(%arg0: i32) -> (i32, i32) {
    %c0_i32 = arith.constant 0 : i32
    %c0_i32_0 = arith.constant 0 : i32
    %c0_i32_1 = arith.constant 0 : i32
    return %c0_i32, %c0_i32_0 : i32, i32
  }
  func.func @transform_5(%arg0: i32) -> (i32, i32) {
    %c0_i32 = arith.constant 0 : i32
    %c0_i32_0 = arith.constant 0 : i32
    %c0_i32_1 = arith.constant 0 : i32
    return %c0_i32, %c0_i32_0 : i32, i32
  }
  func.func @transform_6(%arg0: i32) -> (i32, i32) {
    %c0_i32 = arith.constant 0 : i32
    %c0_i32_0 = arith.constant 0 : i32
    %c0_i32_1 = arith.constant 0 : i32
    return %c0_i32, %c0_i32_0 : i32, i32
  }
  func.func @transform_7(%arg0: i32) -> (i32, i32) {
    %c0_i32 = arith.constant 0 : i32
    %c0_i32_0 = arith.constant 0 : i32
    %c0_i32_1 = arith.constant 0 : i32
    return %c0_i32, %c0_i32_0 : i32, i32
  }
  func.func @transform_8(%arg0: i32) -> (i32, i32) {
    %c0_i32 = arith.constant 0 : i32
    %c0_i32_0 = arith.constant 0 : i32
    %c0_i32_1 = arith.constant 0 : i32
    return %c0_i32, %c0_i32_0 : i32, i32
  }
  func.func @transform_9(%arg0: i32) -> (i32, i32) {
    %c0_i32 = arith.constant 0 : i32
    %c0_i32_0 = arith.constant 0 : i32
    %c0_i32_1 = arith.constant 0 : i32
    return %c0_i32, %c0_i32_0 : i32, i32
  }
  func.func @transform_10(%arg0: i32) -> (i32, i32) {
    %c0_i32 = arith.constant 0 : i32
    %c0_i32_0 = arith.constant 0 : i32
    %c0_i32_1 = arith.constant 0 : i32
    return %c0_i32, %c0_i32_0 : i32, i32
  }
  func.func @transform_11(%arg0: i32) -> (i32, i32) {
    %c0_i32 = arith.constant 0 : i32
    %c0_i32_0 = arith.constant 0 : i32
    return %arg0, %c0_i32 : i32, i32
  }
}

</mosaic_0001>

<bundles_post_ra>
// kernel: tpu_custom_call.1
= control target key start
LH: loop header
LB: loop body
LE: loop exit
PB: predicated region body
PF: predicated region fallthrough
CT: control target
= control target key end

     0   :  { %16 = vsyncpa [#allocation3], 0  ;;  %s1263_s0 = inlined_call_operand.vmem [shape: f32[8,8], index: 0, kind: input, shape index: {}]   ;;  %s1264_s1 = inlined_call_operand.hbm [shape: f32[8,128], index: 1, kind: input, shape index: {}]   ;;  %s1265_s2 = inlined_call_operand.hbm [shape: f32[8,128], index: 2, kind: input, shape index: {}]   ;;  %s1266_s3 = inlined_call_operand.vmem [shape: f32[1,128], index: 3, kind: input, shape index: {}]   ;;  %s1267_s4 = inlined_call_operand.vmem [shape: f32[128,128], index: 4, kind: input, shape index: {}]   ;;  %s1268_s5 = inlined_call_operand.hbm [shape: f32[1,128], index: 5, kind: input, shape index: {}]   ;;  %s1269_s6 = inlined_call_operand.hbm [shape: f32[128,128], index: 6, kind: input, shape index: {}]   ;;  %s1270_s7 = inlined_call_operand.vmem [shape: f32[1,128], index: 7, kind: input, shape index: {}]   ;;  %s1271_s8 = inlined_call_operand.hbm [shape: f32[128,128], index: 8, kind: input, shape index: {}]   ;;  %s1272_s9 = inlined_call_operand.vmem [shape: f32[1,128], index: 9, kind: input, shape index: {}]   ;;  %s1273_s10 = inlined_call_operand.vmem [shape: f32[128,4], index: 10, kind: input, shape index: {}]   ;;  %s1274_s11 = inlined_call_operand.vmem [shape: f32[8,4], index: 11, kind: output, shape index: {}]  }
   0x1   :  { %17 = vsyncpa [#allocation5], 0 }
   0x2   :  { %18 = vsyncpa [#allocation8], 0  ;;  %s977_s17 = smov [#allocation4]   ;;  %s978_s19 = smov [#allocation7]  }
   0x3   :  { %s37_s18 = sshll.u32 %s977_s17, 4  ;;  %s60_s20 = sshll.u32 %s978_s19, 4  ;;  %s38_s18 = int_to_ptr.vmem [resolvable:$true] %s37_s18  ;;  %s61_s20 = int_to_ptr.vmem [resolvable:$true] %s60_s20 }
   0x4   :  { %s879_s21 = scalar_lea.vmem %s38_s18, 128  ;;  %p884_p1 = scmp.lt.s32.totalorder %s38_s18, %s38_s18 }
   0x5   :  { %p880_p0 = scmp.ne.s32.totalorder %s38_s18, %s879_s21  ;;  %p885_p2 = scmp.lt.s32.totalorder %s879_s21, %s879_s21 }
   0x7   :  { %p886_p3 = por %p885_p2, %p884_p1 }
   0x9   :  { %p887_p4 = pnand %p886_p3, %p880_p0 }
   0xb   :  { %890 = shalt.err (!%p887_p4)
}
   0xc   :  { %40 = dma.hbm_to_vmem [thread:$0]  %s1265_s2, 128, %s38_s18, [#allocation5]  }
   0xd   :  { %s899_s24 = scalar_lea.vmem %s61_s20, 2048  ;;  %p904_p6 = scmp.lt.s32.totalorder %s61_s20, %s61_s20 }
   0xe   :  { %p900_p5 = scmp.ne.s32.totalorder %s61_s20, %s899_s24  ;;  %p905_p7 = scmp.lt.s32.totalorder %s899_s24, %s899_s24 }
  0x10   :  { %p906_p8 = por %p905_p7, %p904_p6 }
  0x12   :  { %p907_p9 = pnand %p906_p8, %p900_p5 }
  0x14   :  { %910 = shalt.err (!%p907_p9)
}
  0x15   :  { %s979_s25 = smov 128   ;;  %s980_s26 = smov 8  }
  0x16   :  { %66 = dma.hbm_to_vmem [thread:$0]  %s1269_s6, 2048, %s61_s20, [#allocation8], %s979_s25, %s979_s25, %s980_s26  }
  0x17   :  { %s981_s29 = smov [#allocation2]   ;;  %s982_s12 = smov [#allocation6]  }
  0x18   :  { %s27_s30 = sshll.u32 %s981_s29, 4  ;;  %s51_s2 = sshll.u32 %s982_s12, 4  ;;  %s28_s30 = int_to_ptr.vmem [resolvable:$true] %s27_s30  ;;  %s52_s2 = int_to_ptr.vmem [resolvable:$true] %s51_s2 }
  0x19   :  { %s919_s13 = scalar_lea.vmem %s28_s30, 128  ;;  %p924_p11 = scmp.lt.s32.totalorder %s28_s30, %s28_s30 }
  0x1a   :  { %p920_p10 = scmp.ne.s32.totalorder %s28_s30, %s919_s13  ;;  %p925_p12 = scmp.lt.s32.totalorder %s919_s13, %s919_s13 }
  0x1c   :  { %p926_p13 = por %p925_p12, %p924_p11 }
  0x1e   :  { %p927_p0 = pnand %p926_p13, %p920_p10 }
  0x20   :  { %930 = shalt.err (!%p927_p0)
}
  0x21   :  { %30 = dma.hbm_to_vmem [thread:$0]  %s1264_s1, 128, %s28_s30, [#allocation3]  }
  0x22   :  { %s939_s16 = scalar_lea.vmem %s52_s2, 16  ;;  %s943_s6 = scalar_lea.vmem %s52_s2, 32 }
  0x23   :  { %p940_p1 = scmp.ne.s32.totalorder %s52_s2, %s939_s16  ;;  %p944_p2 = scmp.lt.s32.totalorder %s52_s2, %s52_s2 }
  0x24   :  { %p945_p3 = scmp.lt.s32.totalorder %s943_s6, %s939_s16 }
  0x26   :  { %p946_p4 = por %p945_p3, %p944_p2 }
  0x28   :  { %p947_p5 = pnand %p946_p4, %p940_p1 }
  0x2a   :  { %950 = shalt.err (!%p947_p5)
}
  0x2b   :  { %54 = dma.hbm_to_vmem [thread:$0]  %s1268_s5, 16, %s52_s2, [#allocation5]  }
  0x2c   :  { %s983_s19 = smov [#allocation9]  }
  0x2d   :  { %s74_s20 = sshll.u32 %s983_s19, 4  ;;  %s75_s20 = int_to_ptr.vmem [resolvable:$true] %s74_s20 }
  0x2e   :  { %s959_s21 = scalar_lea.vmem %s75_s20, 2048  ;;  %p964_p7 = scmp.lt.s32.totalorder %s75_s20, %s75_s20 }
  0x2f   :  { %p960_p6 = scmp.ne.s32.totalorder %s75_s20, %s959_s21  ;;  %p965_p8 = scmp.lt.s32.totalorder %s959_s21, %s959_s21 }
  0x31   :  { %p966_p9 = por %p965_p8, %p964_p7 }
  0x33   :  { %p967_p10 = pnand %p966_p9, %p960_p6 }
  0x35   :  { %970 = shalt.err (!%p967_p10)
}
  0x36   :  { %80 = dma.hbm_to_vmem [thread:$0]  %s1271_s8, 2048, %s75_s20, [#allocation8], %s979_s25, %s979_s25, %s980_s26  }
  0x37   :  { %971 = dma.done.wait [#allocation3], 128  }
  0x38   :  { %972 = vsyncadd [#allocation3], 4294967168 }
  0x39   :  { %973 = dma.done.wait [#allocation5], 144  }
  0x3a   :  { %974 = vsyncadd [#allocation5], 4294967152 }
  0x3b   :  { %975 = dma.done.wait [#allocation8], 4096  }
  0x3c   :  { %976 = vsyncadd [#allocation8], 4294963200  ;;  %v984_v0 = vmov 0.0   ;;  %vm985_vm0 = vmmov 0   ;;  %vm102_vm1 = vcmask 64512   ;;  %v176_v1 = vld [vmem:[#allocation4] sm:$0xff] }
  0x3d   :  { %717 = vmatprep.subr.mxu1 %v984_v0  ;;  %719 = vmatprep.mubr.msk.f32.mxu1 %vm985_vm0, %v984_v0  ;;  %v100_v2 = vld [vmem:[%s1263_s0] sm:$0xff]  ;;  %v270_v4 = vld [vmem:[%s1267_s4 + $0x78] sm:$0xff]  ;;  %v269_v5 = vld [vmem:[%s1267_s4 + $0x70] sm:$0xff]  ;;  %vm625_vm2 = vcmask 31744  }
  0x3e   :  { %712 = vmatprep.subr.mxu0 %v984_v0  ;;  %714 = vmatprep.mubr.msk.f32.mxu0 %vm985_vm0, %v984_v0  ;;  %v101_v3 = vld [vmem:[#allocation2] sm:$0xff]  ;;  %v268_v6 = vld [vmem:[%s1267_s4 + $0x68] sm:$0xff]  ;;  %v266_v8 = vld [vmem:[%s1267_s4 + $0x58] sm:$0xff] }
  0x3f   :  { %718 = vmatpush3.msra.mxu1 %v176_v1  ;;  %713 = vmatpush3.msra.mxu0 %v101_v3  ;;  %v267_v7 = vld [vmem:[%s1267_s4 + $0x60] sm:$0xff]  ;;  %v265_v9 = vld [vmem:[%s1267_s4 + $0x50] sm:$0xff]  ;;  %v264_v10 = vld [vmem:[%s1267_s4 + $0x48] sm:$0xff] }
  0x40   :  { %720 = vmatmul.mubr.msk.f32.vlgmr.msra.gmra.mxu1 %vm102_vm1, %v100_v2  ;;  %715 = vmatmul.mubr.msk.f32.vlgmr.msra.gmra.mxu0 %vm102_vm1, %v100_v2  ;;  %v263_v11 = vld [vmem:[%s1267_s4 + $0x40] sm:$0xff]  ;;  %v262_v12 = vld [vmem:[%s1267_s4 + $0x38] sm:$0xff]  ;;  %v261_v13 = vld [vmem:[%s1267_s4 + $0x30] sm:$0xff] }
  0x41   :  { %722 = vmatprep.subr.mxu0 %v984_v0  ;;  %754 = vmatprep.mubr.msk.f32.mxu0 %vm985_vm0, %v984_v0  ;;  %v260_v14 = vld [vmem:[%s1267_s4 + $0x28] sm:$0xff]  ;;  %v259_v15 = vld [vmem:[%s1267_s4 + $0x20] sm:$0xff]  ;;  %v258_v16 = vld [vmem:[%s1267_s4 + $0x18] sm:$0xff] }
  0x42   :  { %723 = vmatpush3.msra.mxu0 %v270_v4  ;;  %757 = vmatprep.subr.mxu1 %v984_v0  ;;  %v257_v17 = vld [vmem:[%s1267_s4 + $0x10] sm:$0xff]  ;;  %v256_v18 = vld [vmem:[%s1267_s4 + $0x8] sm:$0xff]  ;;  %v255_v19 = vld [vmem:[%s1267_s4] sm:$0xff] }
  0x43   :  { %724 = vmatprep.subr.mxu0 %v984_v0  ;;  %789 = vmatprep.mubr.msk.f32.mxu1 %vm985_vm0, %v984_v0  ;;  %v365_v20 = vld [vmem:[#allocation7 + $0x78] sm:$0xff]  ;;  %v364_v21 = vld [vmem:[#allocation7 + $0x70] sm:$0xff]  ;;  %v363_v22 = vld [vmem:[#allocation7 + $0x68] sm:$0xff] }
  0x44   :  { %725 = vmatpush3.msra.mxu0 %v269_v5  ;;  %758 = vmatpush3.msra.mxu1 %v365_v20  ;;  %v362_v23 = vld [vmem:[#allocation7 + $0x60] sm:$0xff]  ;;  %v361_v24 = vld [vmem:[#allocation7 + $0x58] sm:$0xff]  ;;  %v360_v25 = vld [vmem:[#allocation7 + $0x50] sm:$0xff] }
  0x45   :  { %726 = vmatprep.subr.mxu0 %v984_v0  ;;  %759 = vmatprep.subr.mxu1 %v984_v0  ;;  %v359_v26 = vld [vmem:[#allocation7 + $0x48] sm:$0xff]  ;;  %v358_v27 = vld [vmem:[#allocation7 + $0x40] sm:$0xff]  ;;  %v357_v28 = vld [vmem:[#allocation7 + $0x38] sm:$0xff] }
  0x46   :  { %727 = vmatpush3.msra.mxu0 %v268_v6  ;;  %760 = vmatpush3.msra.mxu1 %v364_v21  ;;  %v356_v29 = vld [vmem:[#allocation7 + $0x30] sm:$0xff]  ;;  %v355_v30 = vld [vmem:[#allocation7 + $0x28] sm:$0xff]  ;;  %v354_v31 = vld [vmem:[#allocation7 + $0x20] sm:$0xff] }
  0x47   :  { %728 = vmatprep.subr.mxu0 %v984_v0  ;;  %761 = vmatprep.subr.mxu1 %v984_v0  ;;  %v635_v32 = vld [vmem:[%s1266_s3] ss:$0 sm:$0xff]  ;;  %v353_v39 = vld [vmem:[#allocation7 + $0x18] sm:$0xff]  ;;  %v352_v40 = vld [vmem:[#allocation7 + $0x10] sm:$0xff] }
  0x48   :  { %729 = vmatpush3.msra.mxu0 %v267_v7  ;;  %762 = vmatpush3.msra.mxu1 %v363_v22  ;;  %v351_v41 = vld [vmem:[#allocation7 + $0x8] sm:$0xff]  ;;  %v350_v42 = vld [vmem:[#allocation7] sm:$0xff]  ;;  %v459_v43 = vld [vmem:[#allocation9 + $0x78] sm:$0xff] }
  0x49   :  { %730 = vmatprep.subr.mxu0 %v984_v0  ;;  %763 = vmatprep.subr.mxu1 %v984_v0  ;;  %v458_v44 = vld [vmem:[#allocation9 + $0x70] sm:$0xff]  ;;  %v457_v45 = vld [vmem:[#allocation9 + $0x68] sm:$0xff]  ;;  %v456_v46 = vld [vmem:[#allocation9 + $0x60] sm:$0xff] }
  0x4a   :  { %731 = vmatpush3.msra.mxu0 %v266_v8  ;;  %764 = vmatpush3.msra.mxu1 %v362_v23  ;;  %v455_v47 = vld [vmem:[#allocation9 + $0x58] sm:$0xff]  ;;  %v454_v48 = vld [vmem:[#allocation9 + $0x50] sm:$0xff]  ;;  %v453_v49 = vld [vmem:[#allocation9 + $0x48] sm:$0xff] }
  0x4b   :  { %732 = vmatprep.subr.mxu0 %v984_v0  ;;  %765 = vmatprep.subr.mxu1 %v984_v0  ;;  %v452_v50 = vld [vmem:[#allocation9 + $0x40] sm:$0xff]  ;;  %v451_v51 = vld [vmem:[#allocation9 + $0x38] sm:$0xff]  ;;  %v450_v52 = vld [vmem:[#allocation9 + $0x30] sm:$0xff] }
  0x4c   :  { %733 = vmatpush3.msra.mxu0 %v265_v9  ;;  %766 = vmatpush3.msra.mxu1 %v361_v24  ;;  %v449_v53 = vld [vmem:[#allocation9 + $0x28] sm:$0xff]  ;;  %v448_v54 = vld [vmem:[#allocation9 + $0x20] sm:$0xff]  ;;  %v447_v55 = vld [vmem:[#allocation9 + $0x18] sm:$0xff] }
  0x4d   :  { %734 = vmatprep.subr.mxu0 %v984_v0  ;;  %767 = vmatprep.subr.mxu1 %v984_v0  ;;  %v637_v56 = vld [vmem:[#allocation6] ss:$0 sm:$0xff]  ;;  %v446_v62 = vld [vmem:[#allocation9 + $0x10] sm:$0xff]  ;;  %v445_v63 = vld [vmem:[#allocation9 + $0x8] sm:$0xff] }
  0x4e   :  { %735 = vmatpush3.msra.mxu0 %v264_v10  ;;  %768 = vmatpush3.msra.mxu1 %v360_v25  ;;  %v444_v1 = vld [vmem:[#allocation9] sm:$0xff]  ;;  %v552_v4 = vld [vmem:[%s1273_s10 + $0x68] sm:$0xff]  ;;  %v551_v5 = vld [vmem:[%s1273_s10 + $0x60] sm:$0xff] }
  0x4f   :  { %736 = vmatprep.subr.mxu0 %v984_v0  ;;  %769 = vmatprep.subr.mxu1 %v984_v0  ;;  %v554_v2 = vld [vmem:[%s1273_s10 + $0x78] sm:$0xff]  ;;  %v553_v3 = vld [vmem:[%s1273_s10 + $0x70] sm:$0xff]  ;;  %v548_v8 = vld [vmem:[%s1273_s10 + $0x48] sm:$0xff] }
  0x50   :  { %737 = vmatpush3.msra.mxu0 %v263_v11  ;;  %770 = vmatpush3.msra.mxu1 %v359_v26  ;;  %v550_v6 = vld [vmem:[%s1273_s10 + $0x58] sm:$0xff]  ;;  %v549_v7 = vld [vmem:[%s1273_s10 + $0x50] sm:$0xff]  ;;  %v547_v9 = vld [vmem:[%s1273_s10 + $0x40] sm:$0xff] }
  0x51   :  { %738 = vmatprep.subr.mxu0 %v984_v0  ;;  %771 = vmatprep.subr.mxu1 %v984_v0  ;;  %v546_v10 = vld [vmem:[%s1273_s10 + $0x38] sm:$0xff]  ;;  %v545_v11 = vld [vmem:[%s1273_s10 + $0x30] sm:$0xff]  ;;  %v540_v21 = vld [vmem:[%s1273_s10 + $0x8] sm:$0xff] }
  0x52   :  { %739 = vmatpush3.msra.mxu0 %v262_v12  ;;  %772 = vmatpush3.msra.mxu1 %v358_v27  ;;  %v544_v12 = vld [vmem:[%s1273_s10 + $0x28] sm:$0xff]  ;;  %v541_v20 = vld [vmem:[%s1273_s10 + $0x10] sm:$0xff]  ;;  %v539_v22 = vld [vmem:[%s1273_s10] sm:$0xff] }
  0x53   :  { %740 = vmatprep.subr.mxu0 %v984_v0  ;;  %773 = vmatprep.subr.mxu1 %v984_v0  ;;  %v639_v23 = vld [vmem:[%s1272_s9] ss:$0 sm:$0xff] }
  0x54   :  { %741 = vmatpush3.msra.mxu0 %v261_v13  ;;  %774 = vmatpush3.msra.mxu1 %v357_v28  ;;  %v543_v13 = vld [vmem:[%s1273_s10 + $0x20] sm:$0xff] }
  0x55   :  { %742 = vmatprep.subr.mxu0 %v984_v0  ;;  %775 = vmatprep.subr.mxu1 %v984_v0 }
  0x56   :  { %743 = vmatpush3.msra.mxu0 %v260_v14  ;;  %776 = vmatpush3.msra.mxu1 %v356_v29  ;;  %v638_v14 = vld [vmem:[%s1270_s7] ss:$0 sm:$0xff] }
  0x57   :  { %744 = vmatprep.subr.mxu0 %v984_v0  ;;  %777 = vmatprep.subr.mxu1 %v984_v0 }
  0x58   :  { %745 = vmatpush3.msra.mxu0 %v259_v15  ;;  %778 = vmatpush3.msra.mxu1 %v355_v30 }
  0x59   :  { %746 = vmatprep.subr.mxu0 %v984_v0  ;;  %779 = vmatprep.subr.mxu1 %v984_v0 }
  0x5a   :  { %747 = vmatpush3.msra.mxu0 %v258_v16  ;;  %780 = vmatpush3.msra.mxu1 %v354_v31 }
  0x5b   :  { %748 = vmatprep.subr.mxu0 %v984_v0  ;;  %781 = vmatprep.subr.mxu1 %v984_v0 }
  0x5c   :  { %749 = vmatpush3.msra.mxu0 %v257_v17  ;;  %782 = vmatpush3.msra.mxu1 %v353_v39 }
  0x5d   :  { %750 = vmatprep.subr.mxu0 %v984_v0  ;;  %783 = vmatprep.subr.mxu1 %v984_v0 }
  0x5e   :  { %751 = vmatpush3.msra.mxu0 %v256_v18  ;;  %784 = vmatpush3.msra.mxu1 %v352_v40 }
  0x5f   :  { %752 = vmatprep.subr.mxu0 %v984_v0  ;;  %785 = vmatprep.subr.mxu1 %v984_v0 }
  0x60   :  { %753 = vmatpush3.msra.mxu0 %v255_v19  ;;  %786 = vmatpush3.msra.mxu1 %v351_v41  ;;  %v542_v19 = vld [vmem:[%s1273_s10 + $0x18] sm:$0xff] }
  0x61   :  { %792 = vmatprep.subr.mxu0 %v984_v0  ;;  %787 = vmatprep.subr.mxu1 %v984_v0 }
  0x62   :  { %788 = vmatpush3.msra.mxu1 %v350_v42 }
  0x63   :  { %827 = vmatprep.subr.mxu1 %v984_v0 }
 0x100   :  { %v250_v33 = vpop.f32.mrf.mxu1  ;;  %v1161_v34 = vpop.f32.mrf.mxu0 }
 0x101   :  { %v251_v35 = vadd.f32 %v635_v32, %v250_v33 }
 0x102   :  { %v721_v36 = vpop.f32.mrf.mxu1  ;;  %v716_v37 = vpop.f32.mrf.mxu0 }
 0x103   :  { %v254_v38 = vmax.f32 %v251_v35, 0.0 }
 0x105   :  { %755 = vmatmul.mubr.f32.vlgmr.msra.gmra.mxu0 %v254_v38 }
 0x106   :  { %824 = vmatprep.mubr.msk.f32.mxu0 %vm985_vm0, %v984_v0  ;;  %793 = vmatpush3.msra.mxu0 %v459_v43 }
 0x107   :  { %794 = vmatprep.subr.mxu0 %v984_v0 }
 0x108   :  { %795 = vmatpush3.msra.mxu0 %v458_v44 }
 0x109   :  { %796 = vmatprep.subr.mxu0 %v984_v0 }
 0x10a   :  { %797 = vmatpush3.msra.mxu0 %v457_v45 }
 0x10b   :  { %798 = vmatprep.subr.mxu0 %v984_v0 }
 0x10c   :  { %799 = vmatpush3.msra.mxu0 %v456_v46 }
 0x10d   :  { %800 = vmatprep.subr.mxu0 %v984_v0 }
 0x10e   :  { %801 = vmatpush3.msra.mxu0 %v455_v47 }
 0x10f   :  { %802 = vmatprep.subr.mxu0 %v984_v0 }
 0x110   :  { %803 = vmatpush3.msra.mxu0 %v454_v48 }
 0x111   :  { %804 = vmatprep.subr.mxu0 %v984_v0 }
 0x112   :  { %805 = vmatpush3.msra.mxu0 %v453_v49 }
 0x113   :  { %806 = vmatprep.subr.mxu0 %v984_v0 }
 0x114   :  { %807 = vmatpush3.msra.mxu0 %v452_v50 }
 0x115   :  { %808 = vmatprep.subr.mxu0 %v984_v0 }
 0x116   :  { %809 = vmatpush3.msra.mxu0 %v451_v51 }
 0x117   :  { %810 = vmatprep.subr.mxu0 %v984_v0 }
 0x118   :  { %811 = vmatpush3.msra.mxu0 %v450_v52 }
 0x119   :  { %812 = vmatprep.subr.mxu0 %v984_v0 }
 0x11a   :  { %813 = vmatpush3.msra.mxu0 %v449_v53 }
 0x11b   :  { %814 = vmatprep.subr.mxu0 %v984_v0 }
 0x11c   :  { %815 = vmatpush3.msra.mxu0 %v448_v54 }
 0x11d   :  { %816 = vmatprep.subr.mxu0 %v984_v0 }
 0x11e   :  { %817 = vmatpush3.msra.mxu0 %v447_v55 }
 0x11f   :  { %818 = vmatprep.subr.mxu0 %v984_v0 }
 0x120   :  { %819 = vmatpush3.msra.mxu0 %v446_v62 }
 0x121   :  { %820 = vmatprep.subr.mxu0 %v984_v0 }
 0x122   :  { %821 = vmatpush3.msra.mxu0 %v445_v63 }
 0x123   :  { %822 = vmatprep.subr.mxu0 %v984_v0 }
 0x124   :  { %823 = vmatpush3.msra.mxu0 %v444_v1 }
 0x1c5   :  { %v344_v57 = vpop.f32.mrf.mxu0 }
 0x1c6   :  { %v345_v58 = vadd.f32 %v637_v56, %v344_v57 }
 0x1c7   :  { %v756_v59 = vpop.f32.mrf.mxu0 }
 0x1c8   :  { %v348_v60 = vmax.f32 %v345_v58, 0.0 }
 0x1ca   :  { %v1183_v61 = vadd.f32 %v348_v60, %v1161_v34 }
 0x1cc   :  { %790 = vmatmul.mubr.f32.vlgmr.msra.gmra.mxu1 %v1183_v61 }
 0x1cd   :  { %859 = vmatprep.mubr.msk.f32.mxu1 %vm985_vm0, %v984_v0  ;;  %828 = vmatpush3.msra.mxu1 %v554_v2 }
 0x1ce   :  { %829 = vmatprep.subr.mxu1 %v984_v0 }
 0x1cf   :  { %830 = vmatpush3.msra.mxu1 %v553_v3 }
 0x1d0   :  { %831 = vmatprep.subr.mxu1 %v984_v0 }
 0x1d1   :  { %832 = vmatpush3.msra.mxu1 %v552_v4 }
 0x1d2   :  { %833 = vmatprep.subr.mxu1 %v984_v0 }
 0x1d3   :  { %834 = vmatpush3.msra.mxu1 %v551_v5 }
 0x1d4   :  { %835 = vmatprep.subr.mxu1 %v984_v0 }
 0x1d5   :  { %836 = vmatpush3.msra.mxu1 %v550_v6 }
 0x1d6   :  { %837 = vmatprep.subr.mxu1 %v984_v0 }
 0x1d7   :  { %838 = vmatpush3.msra.mxu1 %v549_v7 }
 0x1d8   :  { %839 = vmatprep.subr.mxu1 %v984_v0 }
 0x1d9   :  { %840 = vmatpush3.msra.mxu1 %v548_v8 }
 0x1da   :  { %841 = vmatprep.subr.mxu1 %v984_v0 }
 0x1db   :  { %842 = vmatpush3.msra.mxu1 %v547_v9 }
 0x1dc   :  { %843 = vmatprep.subr.mxu1 %v984_v0 }
 0x1dd   :  { %844 = vmatpush3.msra.mxu1 %v546_v10 }
 0x1de   :  { %845 = vmatprep.subr.mxu1 %v984_v0 }
 0x1df   :  { %846 = vmatpush3.msra.mxu1 %v545_v11 }
 0x1e0   :  { %847 = vmatprep.subr.mxu1 %v984_v0 }
 0x1e1   :  { %848 = vmatpush3.msra.mxu1 %v544_v12 }
 0x1e2   :  { %849 = vmatprep.subr.mxu1 %v984_v0 }
 0x1e3   :  { %850 = vmatpush3.msra.mxu1 %v543_v13 }
 0x1e4   :  { %851 = vmatprep.subr.mxu1 %v984_v0 }
 0x1e5   :  { %852 = vmatpush3.msra.mxu1 %v542_v19 }
 0x1e6   :  { %853 = vmatprep.subr.mxu1 %v984_v0 }
 0x1e7   :  { %854 = vmatpush3.msra.mxu1 %v541_v20 }
 0x1e8   :  { %855 = vmatprep.subr.mxu1 %v984_v0 }
 0x1e9   :  { %856 = vmatpush3.msra.mxu1 %v540_v21 }
 0x1ea   :  { %857 = vmatprep.subr.mxu1 %v984_v0 }
 0x1eb   :  { %858 = vmatpush3.msra.mxu1 %v539_v22 }
 0x28c   :  { %v439_v15 = vpop.f32.mrf.mxu1 }
 0x28d   :  { %v440_v16 = vadd.f32 %v638_v14, %v439_v15 }
 0x28e   :  { %v791_v17 = vpop.f32.mrf.mxu1 }
 0x28f   :  { %v443_v18 = vmax.f32 %v440_v16, 0.0 }
 0x291   :  { %825 = vmatmul.mubr.f32.vlgmr.msra.gmra.mxu0 %v443_v18 }
 0x351   :  { %v533_v24 = vpop.f32.mrf.mxu0 }
 0x352   :  { %v534_v25 = vadd.f32 %v639_v23, %v533_v24 }
 0x353   :  { %v826_v26 = vpop.f32.mrf.mxu0 }
 0x354   :  { %v537_v27 = vmax.f32 %v534_v25, 0.0 }
 0x356   :  { %v538_v28 = vadd.f32 %v537_v27, %v1183_v61 }
 0x358   :  { %860 = vmatmul.mubr.f32.vlgmr.msra.gmra.mxu1 %v538_v28 }
 0x418   :  { %v621_v29 = vpop.f32.mrf.mxu1 }
 0x419   :  { %626 = vst.msk [vmem:[%s1274_s11] sm:$0xff] %vm625_vm2, %v621_v29 }
 0x41a   :  { %v861_v0 = vpop.f32.mrf.mxu1 }
 0x41b   :  { %631 = vsyncpa [#allocation3], 1 }
 0x41c   :  { %632 = vsyncpa [#allocation5], 1 }
 0x41d   :  { %633 = vsyncpa [#allocation8], 1 }

</bundles_post_ra>
